<compile_context>
chip_gen: v6e
topology: v6e:2x2x1
jax: 0.10.0
libtpu: 0.0.40
codegen_flags: <defaults>
</compile_context>

<pallas_src>
import jax
import jax.numpy as jnp
from jax.experimental import pallas as pl
from jax.experimental.pallas import tpu as pltpu


# ---------------------------------------------------------------------------
# small helpers
# ---------------------------------------------------------------------------
def _round_up(x, m):
    return (x + m - 1) // m * m


def _pad_to(x, shape):
    pads = [(0, t - s) for s, t in zip(x.shape, shape)]
    if all(p == (0, 0) for p in pads):
        return x
    return jnp.pad(x, pads)


def _const_spec(shape):
    zeros = (0,) * len(shape)
    return pl.BlockSpec(shape, lambda b: zeros)


def _tpu_vmem_capacity():
    """Physical VMEM bytes; conservative (v7x-like) default if the query fails."""
    cap = 64 * 2**20
    try:
        info = pltpu.get_tpu_info()
        cap = int(getattr(info, "vmem_capacity_bytes", cap) or cap)
    except Exception:  # not on a TPU / old TpuInfo layout -> conservative default
        pass
    return cap


def _per_step_act_bytes(tb, s_pad, h_pad):
    """Double-buffered activation/output block bytes for one grid step."""
    x_b = tb * s_pad * h_pad * 2          # bf16 activations
    adj = tb * s_pad * s_pad * 2          # bf16 adjacency
    inv = tb * s_pad * 128 * 4            # f32 (.,.,1) block, lane-padded to 128
    seq = tb * s_pad * h_pad * 2          # bf16 sequence_out block
    pool = tb * 8 * h_pad * 4             # f32 (tb,1,H) pooler block, sublane-padded
    return 2 * (x_b + adj + inv + seq + pool)


def _const_block_bytes(h_pad):
    """Weight/bias block bytes; deterministically counted as double-buffered."""
    return 2 * (4 * h_pad * h_pad * 2 + 3 * 8 * h_pad * 4)


def _choose_block_b(B, s_pad, h_pad, act_budget_bytes, n_cores):
    """Largest TB whose double-buffered activation blocks fit the chip budget,
    while keeping >= n_cores grid steps so every TensorCore gets work."""
    tb = min(B, 32)
    while tb > 1 and _per_step_act_bytes(tb, s_pad, h_pad) > act_budget_bytes:
        tb -= 1
    if n_cores > 1 and B >= n_cores:
        tb = min(tb, -(-B // n_cores))    # ceil(B / n_cores) -> >= n_cores steps
    return max(tb, 1)


def _vmem_limit_bytes(tb, s_pad, h_pad, ceiling):
    # activation blocks + constant weight blocks + kernel-internal temporaries
    # (tw / hid / x1 / out f32 plus bf16 casts, per pl.loop iteration -> ~24*S*H)
    need = (_per_step_act_bytes(tb, s_pad, h_pad)
            + _const_block_bytes(h_pad)
            + 24 * s_pad * h_pad)
    # above v5e's 16 MiB default scoped limit, below the chip-specific ceiling
    return int(min(ceiling, max(32 * 2**20, int(need * 1.25))))


# ---------------------------------------------------------------------------
# kernel: GCN + concat-free dense + fused BERT pooler for TB batch rows
# ---------------------------------------------------------------------------
def gcn_dense_pool_kernel(x_ref, adj_ref, invd_ref,
                          wg_ref, bg_ref, wd0_ref, wd1_ref, bd_ref,
                          wp_ref, bp_ref,
                          seq_out_ref, pool_out_ref):
    tb, s, h = x_ref.shape

    # Per-batch-row loop (non-unrolled) keeps only (S,H)-sized f32 temporaries
    # live, bounding vreg/VMEM pressure independent of TB.
    @pl.loop(0, tb)
    def _(i):
        x = x_ref[i]                                             # (S,H) bf16
        a = adj_ref[i]                                           # (S,S) bf16
        inv = invd_ref[i]                                        # (S,1) f32

        # GCN message passing: text_weighted = adj @ x  (MXU, f32 accumulation)
        tw = jnp.dot(a, x, preferred_element_type=jnp.float32)

        # hidden = Linear(text_weighted); gcn_out = relu(hidden / denom)
        x1 = jnp.maximum(
            (jnp.dot(tw.astype(jnp.bfloat16), wg_ref[...],
                     preferred_element_type=jnp.float32) + bg_ref[...]) * inv,
            0.0)

        # dense(cat(x, x1)) == x @ Wd[:H] + x1 @ Wd[H:]   (concat eliminated)
        out = (jnp.dot(x, wd0_ref[...], preferred_element_type=jnp.float32)
               + jnp.dot(x1.astype(jnp.bfloat16), wd1_ref[...],
                         preferred_element_type=jnp.float32)
               + bd_ref[...])

        # dropout(p=0.1) is identity at inference time
        seq_out_ref[i] = out.astype(seq_out_ref.dtype)

    # Fused BERT pooler: tanh(cls @ W_pool + b) on the already-resident x tile.
    cls = x_ref[:, pl.ds(0, 1), :].reshape(tb, h)                # (TB,H) bf16
    pooled = jnp.tanh(
        jnp.dot(cls, wp_ref[...], preferred_element_type=jnp.float32)
        + bp_ref[...])
    pool_out_ref[...] = pooled.reshape(tb, 1, h).astype(pool_out_ref.dtype)


# ---------------------------------------------------------------------------
# wrapper
# ---------------------------------------------------------------------------
def bert_encoder_gcn_forward(last_hidden_state, dependency_graph, params):
    """GCN + concat-dense + pooler hot path of BERTEncoder_GCN.forward."""
    B, S, H = last_hidden_state.shape
    w_gcn, b_gcn, w_dense, b_dense, w_pool, b_pool = params

    s_pad = _round_up(S, 16)    # bf16 sublane packing = 16 rows / vreg
    h_pad = _round_up(H, 128)   # lane-dense; TODO(synk): 256 rounding for v6e MXU
                                # when H is not already a multiple of 256.

    # Chip-aware budgets: v7x-class (<=64 MiB VMEM, 2 TCs) vs v5e/v6e (128 MiB).
    vmem_cap = _tpu_vmem_capacity()
    small_chip = vmem_cap <= 64 * 2**20
    n_cores = 2 if small_chip else 1
    act_budget = (20 * 2**20) if small_chip else (48 * 2**20)
    vmem_ceiling = (40 * 2**20) if small_chip else (96 * 2**20)

    tb = _choose_block_b(B, s_pad, h_pad, act_budget, n_cores)
    b_pad = _round_up(B, tb)
    grid = (b_pad // tb,)

    # Hoisted (exact, f32): 1 / (sum_j adj[b, i, j] + 1)
    inv_denom = 1.0 / (jnp.sum(dependency_graph.astype(jnp.float32),
                               axis=2, keepdims=True) + 1.0)

    # Split the dense weight so the kernel never materialises cat([x, gcn]).
    w_d0, w_d1 = w_dense[:H, :], w_dense[H:, :]

    # Pad to lane/sublane-friendly shapes; cast matmul operands to bf16.
    x_b = _pad_to(last_hidden_state, (b_pad, s_pad, h_pad)).astype(jnp.bfloat16)
    adj_b = _pad_to(dependency_graph, (b_pad, s_pad, s_pad)).astype(jnp.bfloat16)
    invd = _pad_to(inv_denom, (b_pad, s_pad, 1)).astype(jnp.float32)
    wg = _pad_to(w_gcn, (h_pad, h_pad)).astype(jnp.bfloat16)
    wd0 = _pad_to(w_d0, (h_pad, h_pad)).astype(jnp.bfloat16)
    wd1 = _pad_to(w_d1, (h_pad, h_pad)).astype(jnp.bfloat16)
    wp = _pad_to(w_pool, (h_pad, h_pad)).astype(jnp.bfloat16)
    bg = _pad_to(b_gcn, (1, h_pad)).astype(jnp.float32)
    bd = _pad_to(b_dense, (1, h_pad)).astype(jnp.float32)
    bp = _pad_to(b_pool, (1, h_pad)).astype(jnp.float32)

    # Advisory cost estimate so XLA schedules the surrounding pads/casts well.
    flops = (2 * b_pad * s_pad * (s_pad * h_pad + 3 * h_pad * h_pad)
             + 2 * b_pad * h_pad * h_pad)
    bytes_accessed = (x_b.size * 2 + adj_b.size * 2 + invd.size * 4
                      + (wg.size + wd0.size + wd1.size + wp.size) * 2
                      + (bg.size + bd.size + bp.size) * 4
                      + b_pad * s_pad * h_pad * 2 + b_pad * h_pad * 4)
    cost = pl.CostEstimate(flops=int(flops),
                           transcendentals=int(b_pad * h_pad),
                           bytes_accessed=int(bytes_accessed))

    grid_spec = pltpu.PrefetchScalarGridSpec(
        num_scalar_prefetch=0,
        grid=grid,
        in_specs=[
            pl.BlockSpec((tb, s_pad, h_pad), lambda b: (b, 0, 0)),   # x (bf16)
            pl.BlockSpec((tb, s_pad, s_pad), lambda b: (b, 0, 0)),   # adjacency
            pl.BlockSpec((tb, s_pad, 1),     lambda b: (b, 0, 0)),   # 1/denom
            _const_spec((h_pad, h_pad)),                             # W_gcn
            _const_spec((1, h_pad)),                                 # b_gcn
            _const_spec((h_pad, h_pad)),                             # W_dense[:H]
            _const_spec((h_pad, h_pad)),                             # W_dense[H:]
            _const_spec((1, h_pad)),                                 # b_dense
            _const_spec((h_pad, h_pad)),                             # W_pool
            _const_spec((1, h_pad)),                                 # b_pool
        ],
        out_specs=[
            pl.BlockSpec((tb, s_pad, h_pad), lambda b: (b, 0, 0)),   # sequence_out
            pl.BlockSpec((tb, 1, h_pad),     lambda b: (b, 0, 0)),   # pooler_output
        ],
    )

    seq_pad, pool_pad = pl.pallas_call(
        gcn_dense_pool_kernel,
        out_shape=(jax.ShapeDtypeStruct((b_pad, s_pad, h_pad), jnp.bfloat16),
                   jax.ShapeDtypeStruct((b_pad, 1, h_pad), jnp.float32)),
        grid_spec=grid_spec,
        compiler_params=pltpu.CompilerParams(
            dimension_semantics=("parallel",),
            vmem_limit_bytes=_vmem_limit_bytes(tb, s_pad, h_pad, vmem_ceiling)),
        cost_estimate=cost,
    )(x_b, adj_b, invd, wg, bg, wd0, wd1, bd, wp, bp)

    sequence_out = seq_pad[:B, :S, :H]          # bf16
    pooler_output = pool_pad[:B, 0, :H]         # f32
    return sequence_out, pooler_output


def init_params(key, hidden):
    """Deterministic synthetic parameters (shapes match the PyTorch module)."""
    ks = jax.random.split(key, 6)
    scale = 0.02
    w_gcn = scale * jax.random.normal(ks[0], (hidden, hidden), jnp.float32)
    b_gcn = scale * jax.random.normal(ks[1], (1, hidden), jnp.float32)
    w_dense = scale * jax.random.normal(ks[2], (2 * hidden, hidden), jnp.float32)
    b_dense = scale * jax.random.normal(ks[3], (1, hidden), jnp.float32)
    w_pool = scale * jax.random.normal(ks[4], (hidden, hidden), jnp.float32)
    b_pool = scale * jax.random.normal(ks[5], (1, hidden), jnp.float32)
    return w_gcn, b_gcn, w_dense, b_dense, w_pool, b_pool


if __name__ == "__main__":
    B, S, H, VOCAB = 2, 8, 32, 50

    key = jax.random.PRNGKey(0)
    k_ids, k_adj, k_emb, k_par = jax.random.split(key, 4)

    # Module-level inputs (as in BERTEncoder_GCN.forward)
    input_ids = jax.random.randint(k_ids, (B, S), 0, VOCAB)
    attention_mask = jnp.ones((B, S), jnp.float32)
    dependency_graph = jax.random.bernoulli(
        k_adj, p=0.4, shape=(B, S, S)).astype(jnp.float32)

    # TODO(synk): stand-in for the pretrained BERT encoder stack -- deterministic
    # embedding lookup producing last_hidden_state (B, S, H).
    emb_table = 0.02 * jax.random.normal(k_emb, (VOCAB, H), jnp.float32)
    last_hidden_state = emb_table[input_ids] * attention_mask[..., None]

    params = init_params(k_par, H)

    sequence_out, pooler_output = bert_encoder_gcn_forward(
        last_hidden_state, dependency_graph, params)
    jax.block_until_ready((sequence_out, pooler_output))

    assert sequence_out.shape == (B, S, H)
    assert pooler_output.shape == (B, H)

    # Pure-JAX f32 reference of the same math (bf16 operands + bf16 sequence
    # output loosen the tolerance).
    w_gcn, b_gcn, w_dense, b_dense, w_pool, b_pool = params
    tw = jnp.einsum("bij,bjh->bih", dependency_graph, last_hidden_state)
    hid = tw @ w_gcn + b_gcn
    denom = jnp.sum(dependency_graph, axis=2, keepdims=True) + 1.0
    x1 = jax.nn.relu(hid / denom)
    ref_seq = jnp.concatenate([last_hidden_state, x1], axis=-1) @ w_dense + b_dense
    ref_pool = jnp.tanh(last_hidden_state[:, 0, :] @ w_pool + b_pool[0])

    assert jnp.allclose(sequence_out.astype(jnp.float32), ref_seq,
                        atol=2e-3, rtol=2e-2)
    assert jnp.allclose(pooler_output.astype(jnp.float32), ref_pool,
                        atol=2e-3, rtol=2e-2)

    print("KERNEL_OK")
</pallas_src>

<mosaic_0001>
module attributes {stable_mosaic.version = 11 : i64} {
  func.func @gcn_dense_pool_kernel(%arg0: i32, %arg1: memref<1x16x128xbf16, #tpu.memory_space<vmem>>, %arg2: memref<1x16x16xbf16, #tpu.memory_space<vmem>>, %arg3: memref<1x16x1xf32, #tpu.memory_space<vmem>>, %arg4: memref<128x128xbf16, #tpu.memory_space<vmem>>, %arg5: memref<1x128xf32, #tpu.memory_space<vmem>>, %arg6: memref<128x128xbf16, #tpu.memory_space<vmem>>, %arg7: memref<128x128xbf16, #tpu.memory_space<vmem>>, %arg8: memref<1x128xf32, #tpu.memory_space<vmem>>, %arg9: memref<128x128xbf16, #tpu.memory_space<vmem>>, %arg10: memref<1x128xf32, #tpu.memory_space<vmem>>, %arg11: memref<1x16x128xbf16, #tpu.memory_space<vmem>>, %arg12: memref<1x1x128xf32, #tpu.memory_space<vmem>>) attributes {dimension_semantics = [#tpu.dimension_semantics<parallel>], iteration_bounds = array<i64: 2>, scalar_prefetch = 0 : i64, scratch_operands = 0 : i64, tpu.core_type = #tpu.core_type<tc>, window_params = [{transform_indices = @transform_0, window_bounds = array<i64: 1, 16, 128>}, {transform_indices = @transform_1, window_bounds = array<i64: 1, 16, 16>}, {transform_indices = @transform_2, window_bounds = array<i64: 1, 16, 1>}, {pipeline_mode = #tpu.pipeline_mode<synchronous>, transform_indices = @transform_3, window_bounds = array<i64: 128, 128>}, {pipeline_mode = #tpu.pipeline_mode<synchronous>, transform_indices = @transform_4, window_bounds = array<i64: 1, 128>}, {pipeline_mode = #tpu.pipeline_mode<synchronous>, transform_indices = @transform_5, window_bounds = array<i64: 128, 128>}, {pipeline_mode = #tpu.pipeline_mode<synchronous>, transform_indices = @transform_6, window_bounds = array<i64: 128, 128>}, {pipeline_mode = #tpu.pipeline_mode<synchronous>, transform_indices = @transform_7, window_bounds = array<i64: 1, 128>}, {pipeline_mode = #tpu.pipeline_mode<synchronous>, transform_indices = @transform_8, window_bounds = array<i64: 128, 128>}, {pipeline_mode = #tpu.pipeline_mode<synchronous>, transform_indices = @transform_9, window_bounds = array<i64: 1, 128>}, {transform_indices = @transform_10, window_bounds = array<i64: 1, 16, 128>}, {transform_indices = @transform_11, window_bounds = array<i64: 1, 1, 128>}]} {
    %c0_i32 = arith.constant 0 : i32
    %c1_i32 = arith.constant 1 : i32
    %0 = arith.muli %c0_i32, %c1_i32 : i32
    %c0_i32_0 = arith.constant 0 : i32
    %1 = arith.addi %c0_i32_0, %0 : i32
    %2 = arith.index_cast %1 : i32 to index
    %c0 = arith.constant 0 : index
    %c0_1 = arith.constant 0 : index
    %3 = vector.load %arg1[%2, %c0, %c0_1] : memref<1x16x128xbf16, #tpu.memory_space<vmem>>, vector<1x16x128xbf16>
    %4 = vector.shape_cast %3 : vector<1x16x128xbf16> to vector<16x128xbf16>
    %5 = arith.index_cast %1 : i32 to index
    %c0_2 = arith.constant 0 : index
    %c0_3 = arith.constant 0 : index
    %6 = vector.load %arg2[%5, %c0_2, %c0_3] : memref<1x16x16xbf16, #tpu.memory_space<vmem>>, vector<1x16x16xbf16>
    %7 = vector.shape_cast %6 : vector<1x16x16xbf16> to vector<16x16xbf16>
    %8 = arith.index_cast %1 : i32 to index
    %c0_4 = arith.constant 0 : index
    %c0_5 = arith.constant 0 : index
    %9 = vector.load %arg3[%8, %c0_4, %c0_5] : memref<1x16x1xf32, #tpu.memory_space<vmem>>, vector<1x16x1xf32>
    %10 = vector.shape_cast %9 : vector<1x16x1xf32> to vector<16x1xf32>
    %cst = arith.constant dense<0.000000e+00> : vector<16x128xf32>
    %11 = tpu.matmul %7, %4, %cst {dimension_numbers = #tpu.dot_dimension_numbers<[1], [0], [0], [1], [0, 0, 1, 1], [], []>} : vector<16x16xbf16>, vector<16x128xbf16>, vector<16x128xf32> -> vector<16x128xf32>
    %12 = arith.truncf %11 : vector<16x128xf32> to vector<16x128xbf16>
    %c0_6 = arith.constant 0 : index
    %c0_7 = arith.constant 0 : index
    %13 = vector.load %arg4[%c0_6, %c0_7] : memref<128x128xbf16, #tpu.memory_space<vmem>>, vector<128x128xbf16>
    %cst_8 = arith.constant dense<0.000000e+00> : vector<16x128xf32>
    %14 = tpu.matmul %12, %13, %cst_8 {dimension_numbers = #tpu.dot_dimension_numbers<[1], [0], [0], [1], [0, 0, 1, 1], [], []>} : vector<16x128xbf16>, vector<128x128xbf16>, vector<16x128xf32> -> vector<16x128xf32>
    %c0_9 = arith.constant 0 : index
    %c0_10 = arith.constant 0 : index
    %15 = vector.load %arg5[%c0_9, %c0_10] : memref<1x128xf32, #tpu.memory_space<vmem>>, vector<1x128xf32>
    %16 = vector.broadcast %15 : vector<1x128xf32> to vector<16x128xf32>
    %17 = arith.addf %14, %16 : vector<16x128xf32>
    %18 = vector.broadcast %10 : vector<16x1xf32> to vector<16x128xf32>
    %19 = arith.mulf %17, %18 : vector<16x128xf32>
    %cst_11 = arith.constant 0.000000e+00 : f32
    %20 = vector.broadcast %cst_11 : f32 to vector<16x128xf32>
    %21 = arith.maximumf %19, %20 : vector<16x128xf32>
    %c0_12 = arith.constant 0 : index
    %c0_13 = arith.constant 0 : index
    %22 = vector.load %arg6[%c0_12, %c0_13] : memref<128x128xbf16, #tpu.memory_space<vmem>>, vector<128x128xbf16>
    %cst_14 = arith.constant dense<0.000000e+00> : vector<16x128xf32>
    %23 = tpu.matmul %4, %22, %cst_14 {dimension_numbers = #tpu.dot_dimension_numbers<[1], [0], [0], [1], [0, 0, 1, 1], [], []>} : vector<16x128xbf16>, vector<128x128xbf16>, vector<16x128xf32> -> vector<16x128xf32>
    %24 = arith.truncf %21 : vector<16x128xf32> to vector<16x128xbf16>
    %c0_15 = arith.constant 0 : index
    %c0_16 = arith.constant 0 : index
    %25 = vector.load %arg7[%c0_15, %c0_16] : memref<128x128xbf16, #tpu.memory_space<vmem>>, vector<128x128xbf16>
    %cst_17 = arith.constant dense<0.000000e+00> : vector<16x128xf32>
    %26 = tpu.matmul %24, %25, %cst_17 {dimension_numbers = #tpu.dot_dimension_numbers<[1], [0], [0], [1], [0, 0, 1, 1], [], []>} : vector<16x128xbf16>, vector<128x128xbf16>, vector<16x128xf32> -> vector<16x128xf32>
    %27 = arith.addf %23, %26 : vector<16x128xf32>
    %c0_18 = arith.constant 0 : index
    %c0_19 = arith.constant 0 : index
    %28 = vector.load %arg8[%c0_18, %c0_19] : memref<1x128xf32, #tpu.memory_space<vmem>>, vector<1x128xf32>
    %29 = vector.broadcast %28 : vector<1x128xf32> to vector<16x128xf32>
    %30 = arith.addf %27, %29 : vector<16x128xf32>
    %31 = arith.truncf %30 : vector<16x128xf32> to vector<16x128xbf16>
    %32 = arith.index_cast %1 : i32 to index
    %c0_20 = arith.constant 0 : index
    %c0_21 = arith.constant 0 : index
    %33 = vector.load %arg11[%32, %c0_20, %c0_21] : memref<1x16x128xbf16, #tpu.memory_space<vmem>>, vector<1x16x128xbf16>
    %34 = vector.shape_cast %33 : vector<1x16x128xbf16> to vector<16x128xbf16>
    %35 = vector.shape_cast %31 : vector<16x128xbf16> to vector<1x16x128xbf16>
    tpu.vector_store %arg11[%32, %c0_20, %c0_21], %35 {strides = array<i32>} : memref<1x16x128xbf16, #tpu.memory_space<vmem>>, vector<1x16x128xbf16>,
    %c1_i32_22 = arith.constant 1 : i32
    %c0_23 = arith.constant 0 : index
    %c0_24 = arith.constant 0 : index
    %c0_25 = arith.constant 0 : index
    %36 = vector.load %arg1[%c0_23, %c0_24, %c0_25] : memref<1x16x128xbf16, #tpu.memory_space<vmem>>, vector<1x1x128xbf16>
    %37 = vector.shape_cast %36 : vector<1x1x128xbf16> to vector<1x128xbf16>
    %c0_26 = arith.constant 0 : index
    %c0_27 = arith.constant 0 : index
    %38 = vector.load %arg9[%c0_26, %c0_27] : memref<128x128xbf16, #tpu.memory_space<vmem>>, vector<128x128xbf16>
    %cst_28 = arith.constant dense<0.000000e+00> : vector<1x128xf32>
    %39 = tpu.matmul %37, %38, %cst_28 {dimension_numbers = #tpu.dot_dimension_numbers<[1], [0], [0], [1], [0, 0, 1, 1], [], []>} : vector<1x128xbf16>, vector<128x128xbf16>, vector<1x128xf32> -> vector<1x128xf32>
    %c0_29 = arith.constant 0 : index
    %c0_30 = arith.constant 0 : index
    %40 = vector.load %arg10[%c0_29, %c0_30] : memref<1x128xf32, #tpu.memory_space<vmem>>, vector<1x128xf32>
    %41 = arith.addf %39, %40 : vector<1x128xf32>
    %42 = math.tanh %41 : vector<1x128xf32>
    %43 = vector.shape_cast %42 : vector<1x128xf32> to vector<1x1x128xf32>
    %c0_31 = arith.constant 0 : index
    %c0_32 = arith.constant 0 : index
    %c0_33 = arith.constant 0 : index
    %44 = vector.load %arg12[%c0_31, %c0_32, %c0_33] : memref<1x1x128xf32, #tpu.memory_space<vmem>>, vector<1x1x128xf32>
    tpu.vector_store %arg12[%c0_31, %c0_32, %c0_33], %43 {strides = array<i32>} : memref<1x1x128xf32, #tpu.memory_space<vmem>>, vector<1x1x128xf32>,
    return
  }
  func.func @transform_0(%arg0: i32) -> (i32, i32, i32) {
    %c0_i32 = arith.constant 0 : i32
    %c0_i32_0 = arith.constant 0 : i32
    %c0_i32_1 = arith.constant 0 : i32
    return %arg0, %c0_i32, %c0_i32_0 : i32, i32, i32
  }
  func.func @transform_1(%arg0: i32) -> (i32, i32, i32) {
    %c0_i32 = arith.constant 0 : i32
    %c0_i32_0 = arith.constant 0 : i32
    %c0_i32_1 = arith.constant 0 : i32
    return %arg0, %c0_i32, %c0_i32_0 : i32, i32, i32
  }
  func.func @transform_2(%arg0: i32) -> (i32, i32, i32) {
    %c0_i32 = arith.constant 0 : i32
    %c0_i32_0 = arith.constant 0 : i32
    %c0_i32_1 = arith.constant 0 : i32
    return %arg0, %c0_i32, %c0_i32_0 : i32, i32, i32
  }
  func.func @transform_3(%arg0: i32) -> (i32, i32) {
    %c0_i32 = arith.constant 0 : i32
    %c0_i32_0 = arith.constant 0 : i32
    %c0_i32_1 = arith.constant 0 : i32
    return %c0_i32, %c0_i32_0 : i32, i32
  }
  func.func @transform_4(%arg0: i32) -> (i32, i32) {
    %c0_i32 = arith.constant 0 : i32
    %c0_i32_0 = arith.constant 0 : i32
    %c0_i32_1 = arith.constant 0 : i32
    return %c0_i32, %c0_i32_0 : i32, i32
  }
  func.func @transform_5(%arg0: i32) -> (i32, i32) {
    %c0_i32 = arith.constant 0 : i32
    %c0_i32_0 = arith.constant 0 : i32
    %c0_i32_1 = arith.constant 0 : i32
    return %c0_i32, %c0_i32_0 : i32, i32
  }
  func.func @transform_6(%arg0: i32) -> (i32, i32) {
    %c0_i32 = arith.constant 0 : i32
    %c0_i32_0 = arith.constant 0 : i32
    %c0_i32_1 = arith.constant 0 : i32
    return %c0_i32, %c0_i32_0 : i32, i32
  }
  func.func @transform_7(%arg0: i32) -> (i32, i32) {
    %c0_i32 = arith.constant 0 : i32
    %c0_i32_0 = arith.constant 0 : i32
    %c0_i32_1 = arith.constant 0 : i32
    return %c0_i32, %c0_i32_0 : i32, i32
  }
  func.func @transform_8(%arg0: i32) -> (i32, i32) {
    %c0_i32 = arith.constant 0 : i32
    %c0_i32_0 = arith.constant 0 : i32
    %c0_i32_1 = arith.constant 0 : i32
    return %c0_i32, %c0_i32_0 : i32, i32
  }
  func.func @transform_9(%arg0: i32) -> (i32, i32) {
    %c0_i32 = arith.constant 0 : i32
    %c0_i32_0 = arith.constant 0 : i32
    %c0_i32_1 = arith.constant 0 : i32
    return %c0_i32, %c0_i32_0 : i32, i32
  }
  func.func @transform_10(%arg0: i32) -> (i32, i32, i32) {
    %c0_i32 = arith.constant 0 : i32
    %c0_i32_0 = arith.constant 0 : i32
    %c0_i32_1 = arith.constant 0 : i32
    return %arg0, %c0_i32, %c0_i32_0 : i32, i32, i32
  }
  func.func @transform_11(%arg0: i32) -> (i32, i32, i32) {
    %c0_i32 = arith.constant 0 : i32
    %c0_i32_0 = arith.constant 0 : i32
    %c0_i32_1 = arith.constant 0 : i32
    return %arg0, %c0_i32, %c0_i32_0 : i32, i32, i32
  }
}

</mosaic_0001>

<bundles_post_ra>
// kernel: tpu_custom_call.1
= control target key start
LH: loop header
LB: loop body
LE: loop exit
PB: predicated region body
PF: predicated region fallthrough
CT: control target
= control target key end

     0   :  { %s2089_s0 = inlined_call_operand.vmem [shape: bf16[2,16,128], index: 0, kind: input, shape index: {}]   ;;  %s2090_s1 = inlined_call_operand.vmem [shape: bf16[2,16,16], index: 1, kind: input, shape index: {}]   ;;  %s2091_s2 = inlined_call_operand.vmem [shape: f32[2,16,1], index: 2, kind: input, shape index: {}]   ;;  %s2092_s3 = inlined_call_operand.hbm [shape: bf16[128,128], index: 3, kind: input, shape index: {}]   ;;  %s2093_s4 = inlined_call_operand.vmem [shape: f32[1,128], index: 4, kind: input, shape index: {}]   ;;  %s2094_s5 = inlined_call_operand.hbm [shape: bf16[128,128], index: 5, kind: input, shape index: {}]   ;;  %s2095_s6 = inlined_call_operand.hbm [shape: bf16[128,128], index: 6, kind: input, shape index: {}]   ;;  %s2096_s7 = inlined_call_operand.vmem [shape: f32[1,128], index: 7, kind: input, shape index: {}]   ;;  %s2097_s8 = inlined_call_operand.hbm [shape: bf16[128,128], index: 8, kind: input, shape index: {}]   ;;  %s2098_s9 = inlined_call_operand.vmem [shape: f32[1,128], index: 9, kind: input, shape index: {}]   ;;  %s2099_s10 = inlined_call_operand.hbm [shape: bf16[2,16,128], index: 10, kind: output, shape index: {0}]   ;;  %s2100_s11 = inlined_call_operand.hbm [shape: f32[2,1,128], index: 11, kind: output, shape index: {1}]  }
   0x1   :  { %2102 = sst [smem:[#allocation20_spill]] %s2089_s0 }
   0x2   :  { %2103 = sst [smem:[#allocation21_spill]] %s2090_s1 }
   0x3   :  { %17 = vsyncpa [#allocation3], 0 }
   0x4   :  { %18 = vsyncpa [#allocation6], 0 }
   0x5   :  { %19 = vsyncpa [#allocation9], 0 }
   0x6   :  { %20 = vsyncpa [#allocation4], 0 }
   0x7   :  { %22 = vsyncpa [#allocation4 + $0x1], 0 }
   0x8   :  { %23 = vsyncpa [#allocation12], 0 }
   0x9   :  { %25 = vsyncpa [#allocation12 + $0x1], 0  ;;  %s1817_s17 = smov 0   ;;  %s1819_s18 = smov 0  }
   0xa   :  { %s1821_s19 = smov 0   ;;  %s1823_s20 = smov 0  }
   0xb LB: > { %2104 = sst [smem:[#allocation18_spill]] %s1738_s19  ;;  %s1838_s21 = sadd.s32 4294967295, %s1742_s20   ;;  %s1742_s20 = sphi %s1823_s20, %s2117_s20   ;;  %s1738_s19 = sphi %s1821_s19, %s2114_s19   ;;  %s1734_s18 = sphi %s1819_s18, %s2116_s18   ;;  %s1730_s17 = sphi %s1817_s17, %s2115_s17  }
   0xc   : > { %s1208_s22 = sadd.s32 4294967294, %s1742_s20   ;;  %s1842_s23 = sadd.s32 1, %s1742_s20  }
   0xd   : > { %s263_s24 = sadd.s32 1, %s1738_s19  ;;  %s260_s25 = ssub.s32 %s1742_s20, %s1842_s23 }
   0xe   : > { %p273_p0 = scmp.ne.s32.totalorder %s1738_s19, %s1734_s18  ;;  %p261_p1 = scmp.eq.s32.totalorder %s260_s25, 0 }
   0xf   : > { %p274_p2 = scmp.eq.s32.totalorder %s1838_s21, 1  ;;  %p279_p3 = scmp.ne.s32.totalorder %s1734_s18, %s1730_s17 }
  0x10   : > { %p280_p4 = scmp.eq.s32.totalorder %s1208_s22, 1  ;;  %p1209_p7 = scmp.ge.s32.totalorder %s1742_s20, 1 }
  0x11   : > { %s1853_s26 = scalar_select %p261_p1, %s1738_s19, %s263_s24  }
  0x12   : > { %p1855_p5 = por %p274_p2, %p273_p0  ;;  %p1859_p6 = por %p280_p4, %p279_p3 }
  0x13   : > { %2105 = sst [smem:[#allocation19_spill]] %s1853_s26  ;;  %p313_p8 = scmp.lt.s32.totalorder %s1742_s20, 3 }
  0x14   : > { %p1447_p9 = scmp.eq.s32.totalorder %s1838_s21, 0  ;;  %s1744_s30 = smov [#allocation5]  }
  0x15   : > { %p1866_p10 = pnand %p1209_p7, %p313_p8  ;;  %s341_s12 = sshll.u32 %s1744_s30, 4  ;;  %s342_s12 = int_to_ptr.vmem [resolvable:$true] %s341_s12 }
  0x16   : > { %s1745_s14 = smov [#allocation2]   ;;  %s1746_s16 = smov [#allocation7]  }
  0x17   : > { %p1427_p11 = pneg %p1866_p10  ;;  %s325_s15 = sshll.u32 %s1745_s14, 4  ;;  %s326_s15 = int_to_ptr.vmem [resolvable:$true] %s325_s15 }
  0x18   : > { %s354_s22 = sshll.u32 %s1746_s16, 4  ;;  %s1547_s24 = scalar_lea.vmem %s342_s12, 1024  ;;  %s355_s22 = int_to_ptr.vmem [resolvable:$true] %s354_s22 }
  0x19   : > { %p1874_p12 = pnand %p1447_p9, %p1427_p11  ;;  %p1548_p0 = scmp.ne.s32.totalorder %s342_s12, %s1547_s24 }
  0x1a   : > { %p1555_p3 = scmp.lt.s32.totalorder %s342_s12, %s342_s12  ;;  %p1556_p4 = scmp.lt.s32.totalorder %s1547_s24, %s1547_s24 }
  0x1b   : > { %p1538_p13 = pneg %p1874_p12 }
  0x1c   : > { %p1557_p7 = por %p1556_p4, %p1555_p3 }
  0x1d   : > { %p1550_p1 = pnand %p1548_p0, %p1538_p13 }
  0x1f   : > { %p1551_p2 = pneg %p1550_p1 }
  0x21   : > { %p1558_p8 = pnand %p1557_p7, %p1551_p2 }
  0x23   : > { %1561 = shalt.err (!%p1558_p8)
}
  0x24   : > { %s1747_s25 = smov 64   ;;  %s1748_s30 = smov 4  }
  0x25   : > { %1433 = dma.hbm_to_vmem [thread:$0]  (!%p1874_p12), %s2094_s5, 1024, %s342_s12, [#allocation6], %s1747_s25, %s1747_s25, %s1748_s30  }
  0x26   : > { %s1573_s26 = scalar_lea.vmem %s326_s15, 1024  ;;  %p1581_p2 = scmp.lt.s32.totalorder %s326_s15, %s326_s15 }
  0x27   : > { %p1574_p11 = scmp.ne.s32.totalorder %s326_s15, %s1573_s26  ;;  %p1582_p3 = scmp.lt.s32.totalorder %s1573_s26, %s1573_s26 }
  0x29   : > { %p1576_p0 = pnand %p1574_p11, %p1538_p13  ;;  %p1583_p4 = por %p1582_p3, %p1581_p2 }
  0x2b   : > { %p1577_p1 = pneg %p1576_p0 }
  0x2d   : > { %p1584_p7 = pnand %p1583_p4, %p1577_p1 }
  0x2f   : > { %1587 = shalt.err (!%p1584_p7)
}
  0x30   : > { %1430 = dma.hbm_to_vmem [thread:$0]  (!%p1874_p12), %s2092_s3, 1024, %s326_s15, [#allocation3], %s1747_s25, %s1747_s25, %s1748_s30  }
  0x31   : > { %s1599_s12 = scalar_lea.vmem %s355_s22, 1024  ;;  %p1607_p2 = scmp.lt.s32.totalorder %s355_s22, %s355_s22 }
  0x32   : > { %p1600_p8 = scmp.ne.s32.totalorder %s355_s22, %s1599_s12  ;;  %p1608_p1 = scmp.lt.s32.totalorder %s1599_s12, %s1599_s12 }
  0x34   : > { %p1602_p11 = pnand %p1600_p8, %p1538_p13  ;;  %p1609_p3 = por %p1608_p1, %p1607_p2 }
  0x36   : > { %p1603_p0 = pneg %p1602_p11 }
  0x38   : > { %p1610_p4 = pnand %p1609_p3, %p1603_p0 }
  0x3a   : > { %1613 = shalt.err (!%p1610_p4)
}
  0x3b   : > { %1436 = dma.hbm_to_vmem [thread:$0]  (!%p1874_p12), %s2095_s6, 1024, %s355_s22, [#allocation6], %s1747_s25, %s1747_s25, %s1748_s30  }
  0x3c   : > { %s1749_s15 = smov [#allocation8]  }
  0x3d   : > { %s370_s14 = sshll.u32 %s1749_s15, 4  ;;  %s371_s14 = int_to_ptr.vmem [resolvable:$true] %s370_s14 }
  0x3e   : > { %s1625_s16 = scalar_lea.vmem %s371_s14, 1024  ;;  %p1633_p0 = scmp.lt.s32.totalorder %s371_s14, %s371_s14 }
  0x3f   : > { %p1626_p7 = scmp.ne.s32.totalorder %s371_s14, %s1625_s16  ;;  %p1634_p2 = scmp.lt.s32.totalorder %s1625_s16, %s1625_s16 }
  0x41   : > { %p1628_p8 = pnand %p1626_p7, %p1538_p13  ;;  %p1635_p1 = por %p1634_p2, %p1633_p0 }
  0x43   : > { %p1629_p11 = pneg %p1628_p8 }
  0x45   : > { %p1636_p3 = pnand %p1635_p1, %p1629_p11 }
  0x47   : > { %1639 = shalt.err (!%p1636_p3)
}
  0x48   : > { %1439 = dma.hbm_to_vmem [thread:$0]  (!%p1874_p12), %s2097_s8, 1024, %s371_s14, [#allocation9], %s1747_s25, %s1747_s25, %s1748_s30  }
  0x49   : > { %413 = sbr.rel (%p1866_p10) target bundleno = 752 (0x2f0), region = 60 }
  0x4e   : > { %1709 = dma.done.wait (%p1447_p9), [#allocation3], 1024  }
  0x4f   : > { %1711 = vsyncadd (%p1447_p9), [#allocation3], 4294966272 }
  0x50   : > { %1713 = dma.done.wait (%p1447_p9), [#allocation6], 2048  }
  0x51   : > { %1715 = vsyncadd (%p1447_p9), [#allocation6], 4294965248 }
  0x52   : > { %1717 = dma.done.wait (%p1447_p9), [#allocation9], 1024  }
  0x53   : > { %1719 = vsyncadd (%p1447_p9), [#allocation9], 4294966272  ;;  %p479_p10 = scmp.lt.s32.totalorder %s1838_s21, 1  ;;  %v1750_v0 = vmov 0.0   ;;  %vm1751_vm0 = vmmov 0   ;;  %s2110_s0 = sld [smem:[#allocation20_spill]] }
  0x54   : > { %1321 = vmatprep.subr.bf16.mxu0 %v1750_v0  ;;  %1323 = vmatprep.mubr.msk.bf16.mxu0 %vm1751_vm0, %v1750_v0  ;;  %s2111_s1 = sld [smem:[#allocation21_spill]]  ;;  %v1502_v3 = vld [vmem:[#allocation2 + $0x38] sm:$0xff]   ;;  %vm512_vm1 = vcmask 130048   ;;  %v1503_v4 = vld [vmem:[#allocation2 + $0x30] sm:$0xff]   ;;  %v1504_v5 = vld [vmem:[#allocation2 + $0x28] sm:$0xff]   ;;  %v1752_v12 = vmov 0  }
  0x55   : > { %s1943_s29 = scalar_select %p479_p10, %s1838_s21, 1  ;;  %1327 = vmatprep.subr.bf16.mxu1 %v1750_v0  ;;  %1343 = vmatprep.mubr.msk.bf16.mxu1 %vm1751_vm0, %v1750_v0  ;;  %v1505_v6 = vld [vmem:[#allocation2 + $0x20] sm:$0xff]   ;;  %v1506_v7 = vld [vmem:[#allocation2 + $0x18] sm:$0xff]   ;;  %v1507_v8 = vld [vmem:[#allocation2 + $0x10] sm:$0xff]  }
  0x56   : > { %1328 = vmatpush3.bf16.msra.mxu1 %v1502_v3  ;;  %v1508_v9 = vld [vmem:[#allocation2 + $0x8] sm:$0xff]   ;;  %v1509_v10 = vld [vmem:[#allocation2] sm:$0xff]   ;;  %v1510_v11 = vld [vmem:[#allocation7 + $0x38] sm:$0xff]   ;;  %1499 = vset.pattern.permute.xlu0 %v1752_v12  ;;  %s2008_s25 = sand.u32 1, %s1734_s18  }
  0x57   : > { %s1272_s13 = sshll.u32 %s1943_s29, 3  ;;  %1329 = vmatprep.subr.bf16.mxu1 %v1750_v0  ;;  %s1274_s14 = sshll.u32 %s1943_s29, 4  ;;  %v1512_v14 = vld [vmem:[#allocation7 + $0x30] sm:$0xff]   ;;  %v1514_v16 = vld [vmem:[#allocation7 + $0x28] sm:$0xff]   ;;  %v1516_v17 = vld [vmem:[#allocation7 + $0x20] sm:$0xff]  }
  0x58   : > { %s493_s24 = scalar_lea.vmem %s2091_s2, %s1274_s14  ;;  %v1518_v18 = vld [vmem:[#allocation7 + $0x18] sm:$0xff]   ;;  %v1513_v25 = vld [vmem:[#allocation5 + $0x30] sm:$0xff]   ;;  %v1515_v26 = vld [vmem:[#allocation5 + $0x28] sm:$0xff]   ;;  %s1220_s30 = sshll.u32 %s2008_s25, 3 }
  0x59   : > { %s1952_s12 = scalar_lea.vmem %s2110_s0, %s1272_s13  ;;  %v499_v13 = vld [vmem:[%s493_s24] sm:$0xff]  ;;  %v500_v15 = vld [vmem:[%s493_s24 + $0x8] sm:$0xff]  ;;  %v1511_v22 = vld [vmem:[#allocation5 + $0x38] sm:$0xff]  }
  0x5a   : > { %s488_s15 = scalar_lea.vmem %s2111_s1, %s1272_s13  ;;  %v1958_v1 = vld [vmem:[%s1952_s12] sm:$0xff]   ;;  %1330 = vmatpush3.bf16.msra.mxu1 %v1503_v4  ;;  %672 = vperm.xlu0 %1499, %v499_v13   ;;  %v1519_v28 = vld [vmem:[#allocation5 + $0x18] sm:$0xff]   ;;  %v1520_v29 = vld [vmem:[#allocation7 + $0x10] sm:$0xff]  }
  0x5b   : > { %v1501_v2 = vld [vmem:[%s488_s15] sm:$0xff]   ;;  %1322 = vmatpush3.bf16.msra.mxu0 %v1958_v1  ;;  %1331 = vmatprep.subr.bf16.mxu1 %v1750_v0  ;;  %v1521_v30 = vld [vmem:[#allocation5 + $0x10] sm:$0xff]   ;;  %v1522_v31 = vld [vmem:[#allocation7 + $0x8] sm:$0xff]   ;;  %s472_s15 = scalar_lea.vmem [#allocation10], %s1220_s30  ;;  %s1753_s30 = smov [#allocation10]  }
  0x5c   : > { %1347 = vmatprep.subr.bf16.mxu0 %v1750_v0  ;;  %v1517_v27 = vld [vmem:[#allocation5 + $0x20] sm:$0xff]   ;;  %v1523_v32 = vld [vmem:[#allocation5 + $0x8] sm:$0xff]   ;;  %v1526_v48 = vld [vmem:[#allocation8 + $0x38] sm:$0xff]   ;;  %s1040_s14 = sshll.u32 %s472_s15, 4  ;;  %s1644_s19 = sshll.u32 %s1753_s30, 4  ;;  %s2020_s14 = int_to_ptr.vmem [resolvable:$true] %s1040_s14  ;;  %s1645_s19 = int_to_ptr.vmem [resolvable:$false] %s1644_s19 }
  0x5d   : > { %v1524_v33 = vld [vmem:[#allocation7] sm:$0xff]   ;;  %v1527_v50 = vld [vmem:[#allocation8 + $0x30] sm:$0xff]   ;;  %v1528_v51 = vld [vmem:[#allocation8 + $0x28] sm:$0xff]   ;;  %s1640_s13 = scalar_lea.vmem %s2020_s14, 128  ;;  %s1646_s26 = scalar_lea.vmem %s1645_s19, 256 }
  0x5e   : > { %1324 = vmatmul.mubr.msk.bf16.vlgmr.msra.gmra.mxu0 %vm512_vm1, %v1501_v2  ;;  %1332 = vmatpush3.bf16.msra.mxu1 %v1504_v5  ;;  %v1525_v34 = vld [vmem:[#allocation5] sm:$0xff]   ;;  %v1530_v53 = vld [vmem:[#allocation8 + $0x18] sm:$0xff]   ;;  %v1531_v54 = vld [vmem:[#allocation8 + $0x10] sm:$0xff]   ;;  %p1641_p9 = scmp.ne.s32.totalorder %s2020_s14, %s1640_s13  ;;  %p1647_p4 = scmp.lt.s32.totalorder %s2020_s14, %s1645_s19 }
  0x5f   : > { %1363 = vmatprep.mubr.msk.bf16.mxu0 %vm1751_vm0, %v1750_v0  ;;  %1333 = vmatprep.subr.bf16.mxu1 %v1750_v0  ;;  %v1230_v35 = vld [vmem:[%s2093_s4] ss:$0 sm:$0xff]  ;;  %v1532_v55 = vld [vmem:[#allocation8 + $0x8] sm:$0xff]   ;;  %p1648_p7 = scmp.lt.s32.totalorder %s1646_s26, %s1640_s13 }
  0x60   : > { %1348 = vmatpush3.bf16.msra.mxu0 %v1510_v11  ;;  %677 = vperm.xlu0 %1499, %v500_v15   ;;  %v1529_v52 = vld [vmem:[#allocation8 + $0x20] sm:$0xff]   ;;  %p1642_p12 = pnand %p1641_p9, %p1855_p5 }
  0x61   : > { %1349 = vmatprep.subr.bf16.mxu0 %v1750_v0  ;;  %v1533_v56 = vld [vmem:[#allocation8] sm:$0xff]   ;;  %p1649_p8 = por %p1648_p7, %p1647_p4 }
  0x62   : > { %1334 = vmatpush3.bf16.msra.mxu1 %v1505_v6  ;;  %v914_v57 = vld [vmem:[%s1952_s12] sm:$0x1]  ;;  %s1277_s12 = sshll.u32 %s1838_s21, 7  ;;  %p1643_p13 = pneg %p1642_p12 }
  0x63   : > { %1335 = vmatprep.subr.bf16.mxu1 %v1750_v0  ;;  %s2018_s24 = scalar_lea.hbm %s2099_s10, %s1277_s12 }
  0x64   : > { %1350 = vmatpush3.bf16.msra.mxu0 %v1512_v14  ;;  %p1650_p11 = pnand %p1649_p8, %p1643_p13 }
  0x65   : > { %1351 = vmatprep.subr.bf16.mxu0 %v1750_v0 }
  0x66   : > { %1336 = vmatpush3.bf16.msra.mxu1 %v1506_v7 }
  0x67   : > { %1337 = vmatprep.subr.bf16.mxu1 %v1750_v0 }
  0x68   : > { %1352 = vmatpush3.bf16.msra.mxu0 %v1514_v16 }
  0x69   : > { %1353 = vmatprep.subr.bf16.mxu0 %v1750_v0 }
  0x6a   : > { %1338 = vmatpush3.bf16.msra.mxu1 %v1507_v8 }
  0x6b   : > { %1339 = vmatprep.subr.bf16.mxu1 %v1750_v0 }
  0x6c   : > { %1354 = vmatpush3.bf16.msra.mxu0 %v1516_v17 }
  0x6d   : > { %1355 = vmatprep.subr.bf16.mxu0 %v1750_v0 }
  0x6e   : > { %1340 = vmatpush3.bf16.msra.mxu1 %v1508_v9 }
  0x6f   : > { %1341 = vmatprep.subr.bf16.mxu1 %v1750_v0 }
  0x70   : > { %1356 = vmatpush3.bf16.msra.mxu0 %v1518_v18 }
  0x71   : > { %1357 = vmatprep.subr.bf16.mxu0 %v1750_v0 }
  0x72   : > { %1342 = vmatpush3.bf16.msra.mxu1 %v1509_v10 }
  0x73   : > { %1367 = vmatprep.subr.bf16.mxu1 %v1750_v0 }
  0x74   : > { %1358 = vmatpush3.bf16.msra.mxu0 %v1520_v29 }
  0x75   : > { %1359 = vmatprep.subr.bf16.mxu0 %v1750_v0 }
  0x78   : > { %1360 = vmatpush3.bf16.msra.mxu0 %v1522_v31 }
  0x79   : > { %1361 = vmatprep.subr.bf16.mxu0 %v1750_v0 }
  0x7c   : > { %1362 = vmatpush3.bf16.msra.mxu0 %v1524_v33 }
  0x7d   : > { %1387 = vmatprep.subr.bf16.mxu0 %v1750_v0 }
  0xd5   : > { %v673_v36 = vpop.permute.xlu0 %672 }
  0xdb   : > { %v678_v43 = vpop.permute.xlu0 %677 }
 0x11e   : > { %v550_v19 = vpop.f32.mrf.mxu0 }
 0x120   : > { %v1325_v20 = vpop.f32.mrf.mxu0 }
 0x122   : > { %v553_v21 = vpop.f32.mrf.mxu0 }
 0x123   : > { %v557_v23 = vpack.c.bf16 %v553_v21, %v550_v19 }
 0x124   : > { %v1326_v24 = vpop.f32.mrf.mxu0 }
 0x125   : > { %1344 = vmatmul.mubr.bf16.vlgmr.msra.gmra.mxu1 %v557_v23 }
 0x126   : > { %1368 = vmatpush3.bf16.msra.mxu1 %v1511_v22  ;;  %1383 = vmatprep.mubr.msk.bf16.mxu1 %vm1751_vm0, %v1750_v0 }
 0x127   : > { %1369 = vmatprep.subr.bf16.mxu1 %v1750_v0 }
 0x12a   : > { %1370 = vmatpush3.bf16.msra.mxu1 %v1513_v25 }
 0x12b   : > { %1371 = vmatprep.subr.bf16.mxu1 %v1750_v0 }
 0x12e   : > { %1372 = vmatpush3.bf16.msra.mxu1 %v1515_v26 }
 0x12f   : > { %1373 = vmatprep.subr.bf16.mxu1 %v1750_v0 }
 0x132   : > { %1374 = vmatpush3.bf16.msra.mxu1 %v1517_v27 }
 0x133   : > { %1375 = vmatprep.subr.bf16.mxu1 %v1750_v0 }
 0x136   : > { %1376 = vmatpush3.bf16.msra.mxu1 %v1519_v28 }
 0x137   : > { %1377 = vmatprep.subr.bf16.mxu1 %v1750_v0 }
 0x13a   : > { %1378 = vmatpush3.bf16.msra.mxu1 %v1521_v30 }
 0x13b   : > { %1379 = vmatprep.subr.bf16.mxu1 %v1750_v0 }
 0x13e   : > { %1380 = vmatpush3.bf16.msra.mxu1 %v1523_v32 }
 0x13f   : > { %1381 = vmatprep.subr.bf16.mxu1 %v1750_v0 }
 0x142   : > { %1382 = vmatpush3.bf16.msra.mxu1 %v1525_v34 }
 0x145   : > { %1384 = vmatmul.mubr.bf16.vlgmr.msra.gmra.mxu1 %v1958_v1 }
 0x1e5   : > { %v663_v37 = vpop.f32.mrf.mxu1 }
 0x1e6   : > { %v664_v38 = vadd.f32 %v1230_v35, %v663_v37 }
 0x1e7   : > { %v1345_v39 = vpop.f32.mrf.mxu1 }
 0x1e8   : > { %v680_v41 = vmul.f32 %v673_v36, %v664_v38 }
 0x1e9   : > { %v666_v40 = vpop.f32.mrf.mxu1 }
 0x1ea   : > { %v667_v42 = vadd.f32 %v1230_v35, %v666_v40  ;;  %v682_v46 = vmax.f32 %v680_v41, 0.0 }
 0x1eb   : > { %v1346_v44 = vpop.f32.mrf.mxu1 }
 0x1ec   : > { %v681_v45 = vmul.f32 %v678_v43, %v667_v42 }
 0x1ee   : > { %v683_v47 = vmax.f32 %v681_v45, 0.0 }
 0x1f0   : > { %v700_v49 = vpack.c.bf16 %v683_v47, %v682_v46 }
 0x1f2   : > { %1364 = vmatmul.mubr.bf16.vlgmr.msra.gmra.mxu0 %v700_v49 }
 0x1f3   : > { %1388 = vmatpush3.bf16.msra.mxu0 %v1526_v48  ;;  %1403 = vmatprep.mubr.msk.bf16.mxu0 %vm1751_vm0, %v1750_v0 }
 0x1f4   : > { %1389 = vmatprep.subr.bf16.mxu0 %v1750_v0 }
 0x1f7   : > { %1390 = vmatpush3.bf16.msra.mxu0 %v1527_v50 }
 0x1f8   : > { %1391 = vmatprep.subr.bf16.mxu0 %v1750_v0 }
 0x1fb   : > { %1392 = vmatpush3.bf16.msra.mxu0 %v1528_v51 }
 0x1fc   : > { %1393 = vmatprep.subr.bf16.mxu0 %v1750_v0 }
 0x1ff   : > { %1394 = vmatpush3.bf16.msra.mxu0 %v1529_v52 }
 0x200   : > { %1395 = vmatprep.subr.bf16.mxu0 %v1750_v0 }
 0x203   : > { %1396 = vmatpush3.bf16.msra.mxu0 %v1530_v53 }
 0x204   : > { %1397 = vmatprep.subr.bf16.mxu0 %v1750_v0 }
 0x205   : > { %v888_v58 = vpop.f32.mrf.mxu1 }
 0x207   : > { %1398 = vmatpush3.bf16.msra.mxu0 %v1531_v54  ;;  %v1385_v59 = vpop.f32.mrf.mxu1 }
 0x208   : > { %1399 = vmatprep.subr.bf16.mxu0 %v1750_v0 }
 0x209   : > { %v891_v60 = vpop.f32.mrf.mxu1 }
 0x20b   : > { %1400 = vmatpush3.bf16.msra.mxu0 %v1532_v55  ;;  %v1386_v61 = vpop.f32.mrf.mxu1 }
 0x20c   : > { %1401 = vmatprep.subr.bf16.mxu0 %v1750_v0  ;;  %v1255_v0 = vld [vmem:[%s2096_s7] ss:$0 sm:$0xff] }
 0x20f   : > { %1402 = vmatpush3.bf16.msra.mxu0 %v1533_v56 }
 0x212   : > { %1404 = vmatmul.mubr.bf16.vlgmr.msra.gmra.mxu0 %v914_v57 }
 0x2b2   : > { %v799_v62 = vpop.f32.mrf.mxu0 }
 0x2b3   : > { %v889_v1 = vadd.f32 %v888_v58, %v799_v62 }
 0x2b4   : > { %v1365_v63 = vpop.f32.mrf.mxu0 }
 0x2b5   : > { %v902_v5 = vadd.f32 %v1255_v0, %v889_v1 }
 0x2b6   : > { %v802_v2 = vpop.f32.mrf.mxu0 }
 0x2b7   : > { %v892_v3 = vadd.f32 %v891_v60, %v802_v2 }
 0x2b8   : > { %v1366_v4 = vpop.f32.mrf.mxu0 }
 0x2b9   : > { %v903_v6 = vadd.f32 %v1255_v0, %v892_v3 }
 0x2bb   : > { %v1281_v7 = vpack.c.bf16 %v903_v6, %v902_v5 }
 0x2bd   : > { %1282 = vst [vmem:[%s472_s15] sm:$0xff] %v1281_v7  }
 0x2be   : > { %1653 = shalt.err (!%p1650_p11)
}
 0x2bf   : > { %s1654_s12 = scalar_lea.hbm %s2018_s24, 128  ;;  %s1658_s22 = scalar_lea.hbm %s2099_s10, 256 }
 0x2c0   : > { %p1655_p0 = scmp.ne.s32.totalorder %s2018_s24, %s1654_s12  ;;  %p1659_p3 = scmp.lt.s32.totalorder %s2018_s24, %s2099_s10 }
 0x2c1   : > { %p1660_p10 = scmp.lt.s32.totalorder %s1658_s22, %s1654_s12 }
 0x2c2   : > { %p1656_p2 = pnand %p1655_p0, %p1855_p5 }
 0x2c3   : > { %p1661_p9 = por %p1660_p10, %p1659_p3 }
 0x2c4   : > { %p1657_p1 = pneg %p1656_p2 }
 0x2c6   : > { %p1662_p12 = pnand %p1661_p9, %p1657_p1 }
 0x2c8   : > { %1665 = shalt.err (!%p1662_p12)
}
 0x2c9   : > { %s1754_s13 = smov 64   ;;  %s1755_s19 = smov 4   ;;  %v931_v8 = vld [vmem:[%s2098_s9] sm:$0x1] }
 0x2ca   : > { %s2112_s26 = scalar_lea.sflag [#allocation4], %s2008_s25  ;;  %s1269_s29 = sshll.u32 %s1838_s21, 4 }
 0x2cb   : > { %1423 = dma.vmem_to_hbm [thread:$0]  (%p1855_p5), %s2020_s14, 128, %s2018_s24, %s2112_s26, %s1754_s13, %s1754_s13, %s1755_s19  }
 0x2cc   : > { %s478_s12 = scalar_lea.vmem [#allocation11], %s2008_s25  ;;  %s2053_s1 = scalar_lea.hbm %s2100_s11, %s1269_s29 }
 0x2cd   : > { %s1056_s22 = sshll.u32 %s478_s12, 4  ;;  %s1028_s14 = scalar_lea.sflag [#allocation12], %s2008_s25  ;;  %s1057_s22 = int_to_ptr.vmem [resolvable:$true] %s1056_s22 }
 0x2ce   : > { %s1666_s24 = scalar_lea.vmem %s1057_s22, 16  ;;  %s1756_s13 = smov [#allocation11]  }
 0x2cf   : > { %p1667_p13 = scmp.ne.s32.totalorder %s1057_s22, %s1666_s24  ;;  %s1670_s19 = sshll.u32 %s1756_s13, 4  ;;  %s1671_s19 = int_to_ptr.vmem [resolvable:$false] %s1670_s19 }
 0x2d0   : > { %s1672_s21 = scalar_lea.vmem %s1671_s19, 32  ;;  %p1673_p8 = scmp.lt.s32.totalorder %s1057_s22, %s1671_s19 }
 0x2d1   : > { %p1668_p4 = pnand %p1667_p13, %p1855_p5  ;;  %p1674_p11 = scmp.lt.s32.totalorder %s1672_s21, %s1666_s24 }
 0x2d2   : > { %v1014_v9 = vpop.f32.mrf.mxu0 }
 0x2d3   : > { %v1015_v10 = vadd.f32 %v1014_v9, %v931_v8  ;;  %p1669_p7 = pneg %p1668_p4  ;;  %p1675_p0 = por %p1674_p11, %p1673_p8 }
 0x2d4   : > { %v1405_v11 = vpop.f32.mrf.mxu0 }
 0x2d5   : > { %1534 = vtanh.f32 %v1015_v10  ;;  %p1676_p2 = pnand %p1675_p0, %p1669_p7 }
 0x2d6   : > { %v1017_v12 = vpop.f32.mrf.mxu0 }
 0x2d8   : > { %v1406_v13 = vpop.f32.mrf.mxu0 }
 0x2e2   : > { %v1535_v14 = vpop.eup %1534 }
 0x2e3   : > { %1021 = vst [vmem:[%s478_s12] sm:$0x1] %v1535_v14 }
 0x2e4   : > { %1679 = shalt.err (!%p1676_p2)
}
 0x2e5   : > { %s1680_s0 = scalar_lea.hbm %s2053_s1, 16  ;;  %s1684_s15 = scalar_lea.hbm %s2100_s11, 32 }
 0x2e6   : > { %p1681_p1 = scmp.ne.s32.totalorder %s2053_s1, %s1680_s0  ;;  %p1685_p9 = scmp.lt.s32.totalorder %s2053_s1, %s2100_s11 }
 0x2e7   : > { %p1686_p12 = scmp.lt.s32.totalorder %s1684_s15, %s1680_s0 }
 0x2e8   : > { %p1682_p3 = pnand %p1681_p1, %p1855_p5 }
 0x2e9   : > { %p1687_p13 = por %p1686_p12, %p1685_p9 }
 0x2ea   : > { %p1683_p10 = pneg %p1682_p3 }
 0x2ec   : > { %p1688_p4 = pnand %p1687_p13, %p1683_p10 }
 0x2ee   : > { %1691 = shalt.err (!%p1688_p4)
}
 0x2ef   : > { %1424 = dma.vmem_to_hbm [thread:$0]  (%p1855_p5), %s1057_s22, 16, %s2053_s1, %s1028_s14  }
 0x2f0 PF: > { %p1455_p7 = scmp.ge.s32.totalorder %s1742_s20, 2  ;;  %s1068_s12 = sand.u32 1, %s1730_s17  }
 0x2f1   : > { %s1069_s30 = scalar_lea.sflag [#allocation4], %s1068_s12 }
 0x2f2   : > { %p1441_p8 = pnand %p1455_p7, %p1859_p6 }
 0x2f4   : > { %p1442_p11 = pneg %p1441_p8 }
 0x2f6   : > { %1721 = dma.done.wait (%p1442_p11), %s1069_s30, 128  }
 0x2f7   : > { %1723 = vsyncadd (%p1442_p11), %s1069_s30, 4294967168  ;;  %s1078_s24 = scalar_lea.sflag [#allocation12], %s1068_s12 }
 0x2f8   : > { %1725 = dma.done.wait (%p1442_p11), %s1078_s24, 16  }
 0x2f9   : > { %1727 = vsyncadd (%p1442_p11), %s1078_s24, 4294967280  ;;  %s2113_s27 = sld [smem:[#allocation18_spill]]  ;;  %p28_p5 = scmp.ge.s32.totalorder %s1842_s23, 4  }
 0x2fa   : > { %s2114_s19 = sld [smem:[#allocation19_spill]]  ;;  %s2115_s17 = smov %s1734_s18 }
 0x2fb   : > { %s2117_s20 = smov %s1842_s23  ;;  %30 = sbr.rel (!%p28_p5) target bundleno = 11 (0xb), region = 135 }
 0x2ff   : > { %s2116_s18 = smov %s2113_s27 }
 0x300   :  { %1082 = vsyncpa [#allocation3], 1 }
 0x301   :  { %1084 = vsyncpa [#allocation3 + $0x1], 1 }
 0x302   :  { %1085 = vsyncpa [#allocation6], 1 }
 0x303   :  { %1086 = vsyncpa [#allocation9], 1 }
 0x304   :  { %1087 = vsyncpa [#allocation4], 1 }
 0x305   :  { %1089 = vsyncpa [#allocation4 + $0x1], 1 }
 0x306   :  { %1090 = vsyncpa [#allocation12], 1 }
 0x307   :  { %1092 = vsyncpa [#allocation12 + $0x1], 1 }

</bundles_post_ra>
